<compile_context>
chip_gen: v5e
topology: v5e:2x2
jax: 0.10.0
libtpu: 0.0.40
codegen_flags: <defaults>
</compile_context>

<pallas_src>
import functools

import jax
import jax.numpy as jnp
from jax.experimental import pallas as pl
from jax.experimental.pallas import tpu as pltpu


# -------------------------- Pallas kernel --------------------------

def _bce_dice_kernel(x_ref, t_ref, out_ref,
                     bce_acc, inter_acc, psum_acc, tsum_acc):
    # grid = (B, OUTER, inner); axis 2 is the reduction over flattened features.
    j = pl.program_id(2)

    @pl.when(j == 0)
    def _init():
        bce_acc[...] = jnp.zeros_like(bce_acc)
        inter_acc[...] = jnp.zeros_like(inter_acc)
        psum_acc[...] = jnp.zeros_like(psum_acc)
        tsum_acc[...] = jnp.zeros_like(tsum_acc)

    x = x_ref[...].astype(jnp.float32)   # (chunk, 128)
    t = t_ref[...].astype(jnp.float32)   # (chunk, 128)

    # Shared transcendental work:
    #   e = exp(-|x|)
    #   BCE-with-logits (PyTorch-stable form): max(x,0) - x*t + log1p(e)
    #   sigmoid(x) = where(x >= 0, 1, e) / (1 + e)
    e = jnp.exp(-jnp.abs(x))
    inv = pl.reciprocal(1.0 + e, approx=True)   # EUP vrcp, ~1e-4 rel err
    probs = jnp.where(x >= 0.0, 1.0, e) * inv
    bce = jnp.maximum(x, 0.0) - x * t + jnp.log1p(e)

    # Fold the (chunk,128) tile down to a single (8,128) vreg per quantity with
    # pure VPU adds (no XLU); accumulators are one vreg each -> 1 load/store per
    # quantity per step instead of chunk/8.
    blk = x.shape[0] // 8

    def _fold(v):
        return v.reshape(blk, 8, 128).sum(axis=0)

    bce_acc[...] += _fold(bce)
    inter_acc[...] += _fold(probs * t)
    psum_acc[...] += _fold(probs)
    tsum_acc[...] += _fold(t)

    @pl.when(j == pl.num_programs(2) - 1)
    def _finalize():
        # Lane-dense (4,8,128) writeback once per (b, outer); no in-kernel
        # cross-lane reduce — the tiny final sums happen in the JAX wrapper.
        out_ref[0] = bce_acc[...]
        out_ref[1] = inter_acc[...]
        out_ref[2] = psum_acc[...]
        out_ref[3] = tsum_acc[...]


# -------------------------- tiling plan --------------------------

def _round_up(n, m):
    return ((n + m - 1) // m) * m


def _plan(B, F_raw, itemsize):
    """Choose (chunk, padded_S, outer, inner) for the reduction grid."""
    S_raw = max(1, -(-F_raw // 128))
    # ~2 MiB per input block: 4096 sublanes for f32, 8192 for bf16.
    cap = max(8, ((2 * 1024 * 1024) // (128 * itemsize)) // 8 * 8)
    # Split the reduction axis when B == 1 so both v7x TensorCores get work.
    outer = 2 if B == 1 else 1
    per = -(-S_raw // outer)
    chunk = min(cap, _round_up(per, 8))
    S = _round_up(S_raw, chunk * outer)     # padded sublane count
    inner = (S // chunk) // outer
    return chunk, S, outer, inner


# -------------------------- pallas_call wrapper --------------------------

def _partial_sums(x, t, chunk, outer, inner):
    """x, t: (B, S, 128) in native dtype -> four (B,) f32 sum vectors."""
    B, S, L = x.shape
    assert L == 128 and S % chunk == 0 and (S // chunk) == outer * inner

    in_spec = pl.BlockSpec((None, chunk, 128),
                           lambda b, o, j: (b, o * inner + j, 0))
    out_spec = pl.BlockSpec((None, 4, 8, 128),
                            lambda b, o, j: (b * outer + o, 0, 0, 0))

    total = B * S * 128
    cost = pl.CostEstimate(
        flops=14 * total,
        transcendentals=3 * total,
        bytes_accessed=total * (x.dtype.itemsize + t.dtype.itemsize)
        + B * outer * 4 * 8 * 128 * 4,
    )

    sums = pl.pallas_call(
        _bce_dice_kernel,
        out_shape=jax.ShapeDtypeStruct((B * outer, 4, 8, 128), jnp.float32),
        grid_spec=pltpu.PrefetchScalarGridSpec(
            num_scalar_prefetch=0,
            grid=(B, outer, inner),
            in_specs=[in_spec, in_spec],
            out_specs=out_spec,
            scratch_shapes=[pltpu.VMEM((8, 128), jnp.float32)] * 4,
        ),
        compiler_params=pltpu.CompilerParams(
            dimension_semantics=("parallel", "parallel", "arbitrary"),
            vmem_limit_bytes=32 * 1024 * 1024),
        cost_estimate=cost,
    )(x, t)

    sums = sums.reshape(B, outer, 4, 8, 128)
    per = jnp.sum(sums, axis=(1, 3, 4))        # (B, 4)
    return per[:, 0], per[:, 1], per[:, 2], per[:, 3]


# -------------------------- Module equivalent --------------------------

@functools.partial(jax.jit, static_argnames=("smooth", "w_bce", "w_dice"))
def bce_dice_loss(logits, targets, *, smooth=1.0, w_bce=1.0, w_dice=1.0):
    """Equivalent of BCEDiceLoss(weights=[w_bce, w_dice]).forward(logits, targets)."""
    B = logits.shape[0]
    F = 1
    for d in logits.shape[1:]:
        F *= d

    itemsize = max(logits.dtype.itemsize, targets.dtype.itemsize)
    chunk, S, outer, inner = _plan(B, F, itemsize)

    def _prep(a, pad_val):
        flat = a.reshape(B, F)
        pad = S * 128 - F
        if pad:
            # Neutral pad element: x = -1e4, t = 0 contributes exactly 0 to the
            # BCE term, sigmoid sum, intersection and target sum.
            flat = jnp.pad(flat, ((0, 0), (0, pad)), constant_values=pad_val)
        return flat.reshape(B, S, 128)

    x = _prep(logits, -1e4)
    tt = _prep(targets, 0)

    bce_sum, inter, psum, tsum = _partial_sums(x, tt, chunk, outer, inner)

    # BCEWithLogitsLoss default reduction='mean' over ALL (original) elements.
    bce_loss = jnp.sum(bce_sum) / (B * F)

    # DiceLoss: per-batch dice, then mean over batch.
    dice = (2.0 * inter + smooth) / (psum + tsum + smooth)
    dice_loss = 1.0 - jnp.mean(dice)

    return w_bce * bce_loss + w_dice * dice_loss


# -------------------------- Demo / check --------------------------

def _reference(logits, targets, smooth=1.0, w_bce=1.0, w_dice=1.0):
    x = logits.astype(jnp.float32)
    t = targets.astype(jnp.float32)
    B = x.shape[0]
    bce = jnp.maximum(x, 0.0) - x * t + jnp.log1p(jnp.exp(-jnp.abs(x)))
    bce_loss = jnp.mean(bce)
    probs = jax.nn.sigmoid(x).reshape(B, -1)
    tf = t.reshape(B, -1)
    inter = jnp.sum(probs * tf, axis=-1)
    dice = (2.0 * inter + smooth) / (jnp.sum(probs, -1) + jnp.sum(tf, -1) + smooth)
    dice_loss = 1.0 - jnp.mean(dice)
    return w_bce * bce_loss + w_dice * dice_loss


if __name__ == "__main__":
    key = jax.random.PRNGKey(0)
    k1, k2, k3, k4, k5, k6 = jax.random.split(key, 6)

    # 1) f32, lane-aligned feature size: (B, C, H, W) = (2, 4, 16, 16).
    logits = jax.random.normal(k1, (2, 4, 16, 16), dtype=jnp.float32)
    targets = jax.random.bernoulli(k2, 0.5, (2, 4, 16, 16)).astype(jnp.float32)
    out = jax.block_until_ready(bce_dice_loss(logits, targets))
    ref = _reference(logits, targets)
    assert jnp.allclose(out, ref, rtol=5e-4, atol=5e-4), (out, ref)

    # 2) Native-bf16 inputs stream straight into the kernel (no wrapper upcast).
    logits_bf = jax.random.normal(k3, (2, 4, 16, 32), dtype=jnp.bfloat16)
    targets_bf = jax.random.bernoulli(k4, 0.5, (2, 4, 16, 32)).astype(jnp.bfloat16)
    out_bf = jax.block_until_ready(bce_dice_loss(logits_bf, targets_bf))
    ref_bf = _reference(logits_bf.astype(jnp.float32),
                        targets_bf.astype(jnp.float32))
    assert jnp.allclose(out_bf, ref_bf, rtol=2e-3, atol=2e-3), (out_bf, ref_bf)

    # 3) Ragged feature size (not a multiple of 128) + B=1 dual-core split path.
    logits_r = jax.random.normal(k5, (1, 3, 7, 9), dtype=jnp.float32)
    targets_r = jax.random.bernoulli(k6, 0.5, (1, 3, 7, 9)).astype(jnp.float32)
    out_r = jax.block_until_ready(bce_dice_loss(logits_r, targets_r))
    ref_r = _reference(logits_r, targets_r)
    assert jnp.allclose(out_r, ref_r, rtol=5e-4, atol=5e-4), (out_r, ref_r)

    print("KERNEL_OK")
</pallas_src>

<mosaic_0001>
module attributes {stable_mosaic.version = 11 : i64} {
  func.func @_bce_dice_kernel(%arg0: i32, %arg1: i32, %arg2: i32, %arg3: memref<1x8x128xf32, #tpu.memory_space<vmem>>, %arg4: memref<1x8x128xf32, #tpu.memory_space<vmem>>, %arg5: memref<1x4x8x128xf32, #tpu.memory_space<vmem>>, %arg6: memref<8x128xf32, #tpu.memory_space<vmem>>, %arg7: memref<8x128xf32, #tpu.memory_space<vmem>>, %arg8: memref<8x128xf32, #tpu.memory_space<vmem>>, %arg9: memref<8x128xf32, #tpu.memory_space<vmem>>) attributes {dimension_semantics = [#tpu.dimension_semantics<parallel>, #tpu.dimension_semantics<parallel>, #tpu.dimension_semantics<arbitrary>], iteration_bounds = array<i64: 2, 1, 1>, scalar_prefetch = 0 : i64, scratch_operands = 4 : i64, tpu.core_type = #tpu.core_type<tc>, window_params = [{transform_indices = @transform_0, window_bounds = array<i64: 1, 8, 128>}, {transform_indices = @transform_1, window_bounds = array<i64: 1, 8, 128>}, {transform_indices = @transform_2, window_bounds = array<i64: 1, 4, 8, 128>}]} {
    %c0_i32 = arith.constant 0 : i32
    %0 = arith.cmpi eq, %arg2, %c0_i32 : i32
    %1 = arith.extui %0 : i1 to i32
    %c0_i32_0 = arith.constant 0 : i32
    %2 = arith.cmpi ne, %1, %c0_i32_0 : i32
    scf.if %2 {
      %cst_32 = arith.constant 0.000000e+00 : f32
      %49 = vector.broadcast %cst_32 : f32 to vector<8x128xf32>
      %c0_33 = arith.constant 0 : index
      %c0_34 = arith.constant 0 : index
      %50 = vector.load %arg6[%c0_33, %c0_34] : memref<8x128xf32, #tpu.memory_space<vmem>>, vector<8x128xf32>
      tpu.vector_store %arg6[%c0_33, %c0_34], %49 {strides = array<i32>} : memref<8x128xf32, #tpu.memory_space<vmem>>, vector<8x128xf32>,
      %cst_35 = arith.constant 0.000000e+00 : f32
      %51 = vector.broadcast %cst_35 : f32 to vector<8x128xf32>
      %c0_36 = arith.constant 0 : index
      %c0_37 = arith.constant 0 : index
      %52 = vector.load %arg7[%c0_36, %c0_37] : memref<8x128xf32, #tpu.memory_space<vmem>>, vector<8x128xf32>
      tpu.vector_store %arg7[%c0_36, %c0_37], %51 {strides = array<i32>} : memref<8x128xf32, #tpu.memory_space<vmem>>, vector<8x128xf32>,
      %cst_38 = arith.constant 0.000000e+00 : f32
      %53 = vector.broadcast %cst_38 : f32 to vector<8x128xf32>
      %c0_39 = arith.constant 0 : index
      %c0_40 = arith.constant 0 : index
      %54 = vector.load %arg8[%c0_39, %c0_40] : memref<8x128xf32, #tpu.memory_space<vmem>>, vector<8x128xf32>
      tpu.vector_store %arg8[%c0_39, %c0_40], %53 {strides = array<i32>} : memref<8x128xf32, #tpu.memory_space<vmem>>, vector<8x128xf32>,
      %cst_41 = arith.constant 0.000000e+00 : f32
      %55 = vector.broadcast %cst_41 : f32 to vector<8x128xf32>
      %c0_42 = arith.constant 0 : index
      %c0_43 = arith.constant 0 : index
      %56 = vector.load %arg9[%c0_42, %c0_43] : memref<8x128xf32, #tpu.memory_space<vmem>>, vector<8x128xf32>
      tpu.vector_store %arg9[%c0_42, %c0_43], %55 {strides = array<i32>} : memref<8x128xf32, #tpu.memory_space<vmem>>, vector<8x128xf32>,
    } else {
    }
    %c0 = arith.constant 0 : index
    %c0_1 = arith.constant 0 : index
    %c0_2 = arith.constant 0 : index
    %3 = vector.load %arg3[%c0, %c0_1, %c0_2] : memref<1x8x128xf32, #tpu.memory_space<vmem>>, vector<1x8x128xf32>
    %4 = vector.shape_cast %3 : vector<1x8x128xf32> to vector<8x128xf32>
    %c0_3 = arith.constant 0 : index
    %c0_4 = arith.constant 0 : index
    %c0_5 = arith.constant 0 : index
    %5 = vector.load %arg4[%c0_3, %c0_4, %c0_5] : memref<1x8x128xf32, #tpu.memory_space<vmem>>, vector<1x8x128xf32>
    %6 = vector.shape_cast %5 : vector<1x8x128xf32> to vector<8x128xf32>
    %7 = math.absf %4 : vector<8x128xf32>
    %cst = arith.constant 0.000000e+00 : f32
    %8 = vector.broadcast %cst : f32 to vector<8x128xf32>
    %9 = arith.subf %8, %7 : vector<8x128xf32>
    %10 = math.exp %9 : vector<8x128xf32>
    %cst_6 = arith.constant 1.000000e+00 : f32
    %11 = vector.broadcast %cst_6 : f32 to vector<8x128xf32>
    %12 = arith.addf %11, %10 : vector<8x128xf32>
    %13 = tpu.reciprocal %12 {approx = true} : vector<8x128xf32> -> vector<8x128xf32>
    %cst_7 = arith.constant 0.000000e+00 : f32
    %14 = vector.broadcast %cst_7 : f32 to vector<8x128xf32>
    %15 = arith.cmpf oge, %4, %14 : vector<8x128xf32>
    %cst_8 = arith.constant 1.000000e+00 : f32
    %16 = vector.broadcast %cst_8 : f32 to vector<8x128xf32>
    %17 = arith.select %15, %16, %10 : vector<8x128xi1>, vector<8x128xf32>
    %18 = arith.mulf %17, %13 : vector<8x128xf32>
    %cst_9 = arith.constant 0.000000e+00 : f32
    %19 = vector.broadcast %cst_9 : f32 to vector<8x128xf32>
    %20 = arith.maximumf %4, %19 : vector<8x128xf32>
    %21 = arith.mulf %4, %6 : vector<8x128xf32>
    %22 = arith.subf %20, %21 : vector<8x128xf32>
    %23 = math.log1p %10 : vector<8x128xf32>
    %24 = arith.addf %22, %23 : vector<8x128xf32>
    %c0_10 = arith.constant 0 : index
    %c0_11 = arith.constant 0 : index
    %25 = vector.load %arg6[%c0_10, %c0_11] : memref<8x128xf32, #tpu.memory_space<vmem>>, vector<8x128xf32>
    %26 = vector.shape_cast %24 : vector<8x128xf32> to vector<1x8x128xf32>
    %cst_12 = arith.constant dense<0.000000e+00> : vector<8x128xf32>
    %27 = vector.multi_reduction <add>, %26, %cst_12 [0] : vector<1x8x128xf32> to vector<8x128xf32>
    %28 = arith.addf %25, %27 : vector<8x128xf32>
    %c0_13 = arith.constant 0 : index
    %c0_14 = arith.constant 0 : index
    %29 = vector.load %arg6[%c0_13, %c0_14] : memref<8x128xf32, #tpu.memory_space<vmem>>, vector<8x128xf32>
    tpu.vector_store %arg6[%c0_13, %c0_14], %28 {strides = array<i32>} : memref<8x128xf32, #tpu.memory_space<vmem>>, vector<8x128xf32>,
    %c0_15 = arith.constant 0 : index
    %c0_16 = arith.constant 0 : index
    %30 = vector.load %arg7[%c0_15, %c0_16] : memref<8x128xf32, #tpu.memory_space<vmem>>, vector<8x128xf32>
    %31 = arith.mulf %18, %6 : vector<8x128xf32>
    %32 = vector.shape_cast %31 : vector<8x128xf32> to vector<1x8x128xf32>
    %cst_17 = arith.constant dense<0.000000e+00> : vector<8x128xf32>
    %33 = vector.multi_reduction <add>, %32, %cst_17 [0] : vector<1x8x128xf32> to vector<8x128xf32>
    %34 = arith.addf %30, %33 : vector<8x128xf32>
    %c0_18 = arith.constant 0 : index
    %c0_19 = arith.constant 0 : index
    %35 = vector.load %arg7[%c0_18, %c0_19] : memref<8x128xf32, #tpu.memory_space<vmem>>, vector<8x128xf32>
    tpu.vector_store %arg7[%c0_18, %c0_19], %34 {strides = array<i32>} : memref<8x128xf32, #tpu.memory_space<vmem>>, vector<8x128xf32>,
    %c0_20 = arith.constant 0 : index
    %c0_21 = arith.constant 0 : index
    %36 = vector.load %arg8[%c0_20, %c0_21] : memref<8x128xf32, #tpu.memory_space<vmem>>, vector<8x128xf32>
    %37 = vector.shape_cast %18 : vector<8x128xf32> to vector<1x8x128xf32>
    %cst_22 = arith.constant dense<0.000000e+00> : vector<8x128xf32>
    %38 = vector.multi_reduction <add>, %37, %cst_22 [0] : vector<1x8x128xf32> to vector<8x128xf32>
    %39 = arith.addf %36, %38 : vector<8x128xf32>
    %c0_23 = arith.constant 0 : index
    %c0_24 = arith.constant 0 : index
    %40 = vector.load %arg8[%c0_23, %c0_24] : memref<8x128xf32, #tpu.memory_space<vmem>>, vector<8x128xf32>
    tpu.vector_store %arg8[%c0_23, %c0_24], %39 {strides = array<i32>} : memref<8x128xf32, #tpu.memory_space<vmem>>, vector<8x128xf32>,
    %c0_25 = arith.constant 0 : index
    %c0_26 = arith.constant 0 : index
    %41 = vector.load %arg9[%c0_25, %c0_26] : memref<8x128xf32, #tpu.memory_space<vmem>>, vector<8x128xf32>
    %42 = vector.shape_cast %6 : vector<8x128xf32> to vector<1x8x128xf32>
    %cst_27 = arith.constant dense<0.000000e+00> : vector<8x128xf32>
    %43 = vector.multi_reduction <add>, %42, %cst_27 [0] : vector<1x8x128xf32> to vector<8x128xf32>
    %44 = arith.addf %41, %43 : vector<8x128xf32>
    %c0_28 = arith.constant 0 : index
    %c0_29 = arith.constant 0 : index
    %45 = vector.load %arg9[%c0_28, %c0_29] : memref<8x128xf32, #tpu.memory_space<vmem>>, vector<8x128xf32>
    tpu.vector_store %arg9[%c0_28, %c0_29], %44 {strides = array<i32>} : memref<8x128xf32, #tpu.memory_space<vmem>>, vector<8x128xf32>,
    %c0_i32_30 = arith.constant 0 : i32
    %46 = arith.cmpi eq, %arg2, %c0_i32_30 : i32
    %47 = arith.extui %46 : i1 to i32
    %c0_i32_31 = arith.constant 0 : i32
    %48 = arith.cmpi ne, %47, %c0_i32_31 : i32
    scf.if %48 {
      %c0_32 = arith.constant 0 : index
      %c0_33 = arith.constant 0 : index
      %49 = vector.load %arg6[%c0_32, %c0_33] : memref<8x128xf32, #tpu.memory_space<vmem>>, vector<8x128xf32>
      %c0_34 = arith.constant 0 : index
      %c0_35 = arith.constant 0 : index
      %c0_36 = arith.constant 0 : index
      %c0_37 = arith.constant 0 : index
      %50 = vector.load %arg5[%c0_34, %c0_35, %c0_36, %c0_37] : memref<1x4x8x128xf32, #tpu.memory_space<vmem>>, vector<1x1x8x128xf32>
      %51 = vector.shape_cast %50 : vector<1x1x8x128xf32> to vector<8x128xf32>
      %52 = vector.shape_cast %49 : vector<8x128xf32> to vector<1x1x8x128xf32>
      tpu.vector_store %arg5[%c0_34, %c0_35, %c0_36, %c0_37], %52 {strides = array<i32>} : memref<1x4x8x128xf32, #tpu.memory_space<vmem>>, vector<1x1x8x128xf32>,
      %c0_38 = arith.constant 0 : index
      %c0_39 = arith.constant 0 : index
      %53 = vector.load %arg7[%c0_38, %c0_39] : memref<8x128xf32, #tpu.memory_space<vmem>>, vector<8x128xf32>
      %c0_40 = arith.constant 0 : index
      %c1 = arith.constant 1 : index
      %c0_41 = arith.constant 0 : index
      %c0_42 = arith.constant 0 : index
      %54 = vector.load %arg5[%c0_40, %c1, %c0_41, %c0_42] : memref<1x4x8x128xf32, #tpu.memory_space<vmem>>, vector<1x1x8x128xf32>
      %55 = vector.shape_cast %54 : vector<1x1x8x128xf32> to vector<8x128xf32>
      %56 = vector.shape_cast %53 : vector<8x128xf32> to vector<1x1x8x128xf32>
      tpu.vector_store %arg5[%c0_40, %c1, %c0_41, %c0_42], %56 {strides = array<i32>} : memref<1x4x8x128xf32, #tpu.memory_space<vmem>>, vector<1x1x8x128xf32>,
      %c0_43 = arith.constant 0 : index
      %c0_44 = arith.constant 0 : index
      %57 = vector.load %arg8[%c0_43, %c0_44] : memref<8x128xf32, #tpu.memory_space<vmem>>, vector<8x128xf32>
      %c0_45 = arith.constant 0 : index
      %c2 = arith.constant 2 : index
      %c0_46 = arith.constant 0 : index
      %c0_47 = arith.constant 0 : index
      %58 = vector.load %arg5[%c0_45, %c2, %c0_46, %c0_47] : memref<1x4x8x128xf32, #tpu.memory_space<vmem>>, vector<1x1x8x128xf32>
      %59 = vector.shape_cast %58 : vector<1x1x8x128xf32> to vector<8x128xf32>
      %60 = vector.shape_cast %57 : vector<8x128xf32> to vector<1x1x8x128xf32>
      tpu.vector_store %arg5[%c0_45, %c2, %c0_46, %c0_47], %60 {strides = array<i32>} : memref<1x4x8x128xf32, #tpu.memory_space<vmem>>, vector<1x1x8x128xf32>,
      %c0_48 = arith.constant 0 : index
      %c0_49 = arith.constant 0 : index
      %61 = vector.load %arg9[%c0_48, %c0_49] : memref<8x128xf32, #tpu.memory_space<vmem>>, vector<8x128xf32>
      %c0_50 = arith.constant 0 : index
      %c3 = arith.constant 3 : index
      %c0_51 = arith.constant 0 : index
      %c0_52 = arith.constant 0 : index
      %62 = vector.load %arg5[%c0_50, %c3, %c0_51, %c0_52] : memref<1x4x8x128xf32, #tpu.memory_space<vmem>>, vector<1x1x8x128xf32>
      %63 = vector.shape_cast %62 : vector<1x1x8x128xf32> to vector<8x128xf32>
      %64 = vector.shape_cast %61 : vector<8x128xf32> to vector<1x1x8x128xf32>
      tpu.vector_store %arg5[%c0_50, %c3, %c0_51, %c0_52], %64 {strides = array<i32>} : memref<1x4x8x128xf32, #tpu.memory_space<vmem>>, vector<1x1x8x128xf32>,
    } else {
    }
    return
  }
  func.func @transform_0(%arg0: i32, %arg1: i32, %arg2: i32) -> (i32, i32, i32) {
    %c1_i32 = arith.constant 1 : i32
    %0 = arith.muli %arg1, %c1_i32 : i32
    %1 = arith.addi %0, %arg2 : i32
    %c0_i32 = arith.constant 0 : i32
    %c0_i32_0 = arith.constant 0 : i32
    return %arg0, %1, %c0_i32 : i32, i32, i32
  }
  func.func @transform_1(%arg0: i32, %arg1: i32, %arg2: i32) -> (i32, i32, i32) {
    %c1_i32 = arith.constant 1 : i32
    %0 = arith.muli %arg1, %c1_i32 : i32
    %1 = arith.addi %0, %arg2 : i32
    %c0_i32 = arith.constant 0 : i32
    %c0_i32_0 = arith.constant 0 : i32
    return %arg0, %1, %c0_i32 : i32, i32, i32
  }
  func.func @transform_2(%arg0: i32, %arg1: i32, %arg2: i32) -> (i32, i32, i32, i32) {
    %c1_i32 = arith.constant 1 : i32
    %0 = arith.muli %arg0, %c1_i32 : i32
    %1 = arith.addi %0, %arg1 : i32
    %c0_i32 = arith.constant 0 : i32
    %c0_i32_0 = arith.constant 0 : i32
    %c0_i32_1 = arith.constant 0 : i32
    %c0_i32_2 = arith.constant 0 : i32
    return %1, %c0_i32, %c0_i32_0, %c0_i32_1 : i32, i32, i32, i32
  }
}

</mosaic_0001>

<bundles_post_ra>
// kernel: bce_dice_loss.1
= control target key start
LH: loop header
LB: loop body
LE: loop exit
PB: predicated region body
PF: predicated region fallthrough
CT: control target
= control target key end

     0   :  { %s453_s9 = smov 0   ;;  %s455_s10 = smov 0   ;;  %s495_s0 = inlined_call_operand.vmem [shape: f32[2,8,128], index: 0, kind: input, shape index: {}]   ;;  %s496_s1 = inlined_call_operand.vmem [shape: f32[2,8,128], index: 1, kind: input, shape index: {}]   ;;  %s497_s2 = inlined_call_operand.vmem [shape: f32[2,4,8,128], index: 2, kind: output, shape index: {}]  }
   0x1   :  { %s457_s11 = smov 0  }
   0x2 LB: > { %s31_s12 = sadd.s32 1, %s432_s10  ;;  %p373_p0 = scmp.ge.s32.totalorder %s436_s11, 1  ;;  %s436_s11 = sphi %s457_s11, %s12_s11   ;;  %s432_s10 = sphi %s455_s10, %s499_s10   ;;  %s428_s9 = sphi %s453_s9, %s498_s9  }
   0x3   : > { %p33_p1 = scmp.ge.s32.totalorder %s31_s12, 2  ;;  %p159_p2 = scmp.lt.s32.totalorder %s436_s11, 3 }
   0x5   : > { %s501_s12 = smov (%p33_p1, %s31_s12), 0  ;;  %p160_p3 = pnand %p373_p0, %p159_p2 }
   0x6   : > { %p194_p4 = scmp.lt.s32.totalorder (!%p160_p3), %s428_s9, 1 }
   0x7   : > { %163 = sbr.rel (%p160_p3) target bundleno = 45 (0x2d), region = 28 }
   0xc   : > { %s503_s9 = smov (!%p194_p4, %s428_s9), 1 }
   0xd   : > { %s374_s13 = sshll.u32 %s503_s9, 3  ;;  %s383_s14 = sshll.u32 %s503_s9, 5 }
   0xe   : > { %s200_s17 = scalar_lea.vmem %s495_s0, %s374_s13  ;;  %s209_s20 = scalar_lea.vmem %s496_s1, %s374_s13 }
   0xf   : > { %s480_s23 = scalar_lea.vmem %s497_s2, %s383_s14  ;;  %v226_v0 = vld [vmem:[%s200_s17] sm:$0xff] }
  0x10   : > { %v227_v1 = vld [vmem:[%s209_s20] sm:$0xff]  ;;  %v228_v2 = vand.u32 2147483647, %v226_v0  ;;  %v237_v9 = vmax.f32 %v226_v0, 0.0  ;;  %vm234_vm0 = vcmp.ge.f32.partialorder %v226_v0, 0.0 }
  0x11   : > { %380 = vst [vmem:[%s480_s23 + $0x18] sm:$0xff] %v227_v1  ;;  %v238_v10 = vmul.f32 %v227_v1, %v226_v0 }
  0x12   : > { %v229_v3 = vsub.f32 0.0, %v228_v2 }
  0x13   : > { %v239_v15 = vsub.f32 %v237_v9, %v238_v10 }
  0x14   : > { %v230_v4 = vmul.f32 1.442695, %v229_v3 }
  0x16   : > { %408 = vpow2.f32 %v230_v4 }
  0x1c   : > { %v409_v5 = vpop.eup %408 }
  0x1d   : > { %v232_v6 = vadd.f32 1.0, %v409_v5  ;;  %v243_v7 = vmul.f32 -0.5, %v409_v5  ;;  %v246_v11 = vand.u32 2147483647, %v409_v5  ;;  %v235_v13 = vsel %vm234_vm0, 1.0, %v409_v5 }
  0x1f   : > { %410 = vlog2.f32 %v232_v6  ;;  %v244_v8 = vadd.f32 1.0, %v243_v7  ;;  %vm247_vm1 = vcmp.lt.f32.partialorder %v246_v11, 0.0004427343 }
  0x20   : > { %412 = vrcp.f32 %v232_v6 }
  0x21   : > { %v245_v12 = vmul.f32 %v409_v5, %v244_v8 }
  0x25   : > { %v411_v14 = vpop.eup %410 }
  0x26   : > { %v413_v16 = vpop.eup %412  ;;  %v242_v17 = vmul.f32 0.6931472, %v411_v14 }
  0x27   : > { %v236_v18 = vmul.f32 %v413_v16, %v235_v13 }
  0x28   : > { %v248_v19 = vsel %vm247_vm1, %v245_v12, %v242_v17 }
  0x29   : > { %v249_v20 = vadd.f32 %v248_v19, %v239_v15  ;;  %v255_v21 = vmul.f32 %v236_v18, %v227_v1  ;;  %379 = vst [vmem:[%s480_s23 + $0x10] sm:$0xff] %v236_v18 }
  0x2b   : > { %271 = vst [vmem:[%s480_s23] sm:$0xff] %v249_v20 }
  0x2c   : > { %378 = vst [vmem:[%s480_s23 + $0x8] sm:$0xff] %v255_v21 }
  0x2d PF: > { %s12_s11 = sadd.s32 1, %s436_s11   ;;  %s498_s9 = smov %s432_s10 }
  0x2e   : > { %p9_p5 = scmp.ge.s32.totalorder %s12_s11, 4   ;;  %s499_s10 = smov %s501_s12 }
  0x30   :  { %11 = sbr.rel (!%p9_p5) target bundleno = 2 (0x2), region = 72 }

</bundles_post_ra>
